<compile_context>
chip_gen: v6e
topology: v6e:2x2x1
jax: 0.10.0
libtpu: 0.0.40
codegen_flags: <defaults>
</compile_context>

<pallas_src>
import jax
import jax.numpy as jnp
from jax.experimental import pallas as pl
from jax.experimental.pallas import tpu as pltpu


# Architecture: layers = [2, 32, 32, 32, 1]  (typical PINN net)
LAYERS = (2, 32, 32, 32, 1)
TILE_B_MAX = 8192  # per-step VMEM traffic is only tens of KiB; EUP-bound regime


def _round_up(x, m):
    return -(-x // m) * m


def _mlp_kernel(x_ref, w0_ref, b0_ref, w1_ref, b1_ref, w2_ref, b2_ref,
                w3_ref, b3_ref, o_ref):
    """Feature-major fused MLP.

    x_ref : [D_in, TILE_B]  batch on the lane axis; normalisation already
                            folded into (w0, b0) in the wrapper.
    w0    : [32, D_in]   b0 : [32, 1]
    w1,w2 : [32, 32]     b1,b2 : [32, 1]
    w3    : [1, 32]      b3 : [1, 1]
    o_ref : [1, TILE_B]  lane-dense output row.
    """
    h = jnp.tanh(jnp.dot(w0_ref[...], x_ref[...],
                         preferred_element_type=jnp.float32) + b0_ref[...])
    h = jnp.tanh(jnp.dot(w1_ref[...], h,
                         preferred_element_type=jnp.float32) + b1_ref[...])
    h = jnp.tanh(jnp.dot(w2_ref[...], h,
                         preferred_element_type=jnp.float32) + b2_ref[...])

    # Output layer (d_out == 1): a [1,32]x[32,TILE_B] MXU pass produces a fully
    # lane-dense [1, TILE_B] row and avoids a [32, TILE_B] VPU temporary plus a
    # cross-sublane reduce.  The MXU is otherwise nearly idle here.
    z = jnp.dot(w3_ref[...], h, preferred_element_type=jnp.float32) + b3_ref[...]

    # Numerically stable softplus  ==  log(1 + exp(z)).
    o_ref[...] = jnp.maximum(z, 0.0) + jnp.log1p(jnp.exp(-jnp.abs(z)))


def _full_spec(shape):
    # Whole-array block, same block for every grid step (weights stay resident
    # in VMEM across the batch loop).
    nd = len(shape)
    return pl.BlockSpec(shape, lambda i, _nd=nd: (0,) * _nd)


def _choose_tile(n):
    """Batch tile (multiple of 128, <= TILE_B_MAX).

    Prefer the largest tile; among tiles that add NO extra padded work and are
    at least half the default tile, prefer one whose grid-step count is EVEN so
    v7x's two TensorCores get balanced work.  v5e/v6e (single TC) never pay for
    this preference because total padded work is never increased.
    """
    n128 = _round_up(n, 128)
    tile_d = min(TILE_B_MAX, n128)
    steps_d = -(-n128 // tile_d)
    padded_d = steps_d * tile_d
    if steps_d % 2 == 0:
        return tile_d
    t = tile_d
    t_min = max(128, tile_d // 2)
    while t >= t_min:
        steps = -(-n128 // t)
        if steps % 2 == 0 and steps * t <= padded_d:
            return t
        t -= 128
    return tile_d


@jax.jit
def net_dense_normalised(x, lb, ub, params):
    """x: [N, LAYERS[0]] f32.  lb/ub: [1, LAYERS[0]] f32.
    params: list of (W [d_in, d_out], b [1, d_out]) per layer (4 layers)."""
    n, d_in = x.shape
    assert d_in == LAYERS[0]
    assert len(params) == len(LAYERS) - 1
    d_out = LAYERS[-1]

    tile = _choose_tile(n)
    n_pad = _round_up(n, tile)
    grid = (n_pad // tile,)

    # Feature-major input with a zero-padded batch tail (one fused XLA
    # pad+transpose; negligible next to the kernel at these sizes).
    # TODO(synk): for very large N, read x batch-major in-kernel to avoid this
    # separate HBM pass.
    xt = jnp.zeros((d_in, n_pad), jnp.float32).at[:, :n].set(
        x.T.astype(jnp.float32))

    # Fold the input normalisation 2*(x-lb)/(ub-lb)-1 == x*scale + shift into
    # layer 0:  W0_eff = diag(scale) @ W0,  b0_eff = b0 + shift @ W0.
    scale = (2.0 / (ub - lb)).astype(jnp.float32)               # [1, d_in]
    shift = (-(2.0 * lb / (ub - lb) + 1.0)).astype(jnp.float32)  # [1, d_in]

    (w0, b0), (w1, b1), (w2, b2), (w3, b3) = [
        (w.astype(jnp.float32), b.astype(jnp.float32)) for (w, b) in params]
    w0_eff = scale.T * w0                                       # [d_in, 32]
    b0_eff = b0 + shift @ w0                                    # [1, 32]

    flat_params = [
        w0_eff.T, b0_eff.T,     # [32, d_in], [32, 1]
        w1.T, b1.T,             # [32, 32],   [32, 1]
        w2.T, b2.T,             # [32, 32],   [32, 1]
        w3.T, b3,               # [1, 32],    [1, 1]
    ]

    in_specs = [pl.BlockSpec((d_in, tile), lambda i: (0, i))] + [
        _full_spec(tuple(p.shape)) for p in flat_params]
    out_specs = pl.BlockSpec((d_out, tile), lambda i: (0, i))

    dims = LAYERS
    flops = 2 * n_pad * sum(dims[i] * dims[i + 1] for i in range(len(dims) - 1))
    transcendentals = n_pad * (sum(dims[1:-1]) + 2)             # tanh + exp + log1p
    bytes_accessed = 4 * (n_pad * (d_in + d_out)
                          + sum(int(p.size) for p in flat_params))

    out_t = pl.pallas_call(
        _mlp_kernel,
        out_shape=jax.ShapeDtypeStruct((d_out, n_pad), jnp.float32),
        grid=grid,
        in_specs=in_specs,
        out_specs=out_specs,
        compiler_params=pltpu.CompilerParams(
            dimension_semantics=("parallel",)),
        cost_estimate=pl.CostEstimate(
            flops=flops,
            transcendentals=transcendentals,
            bytes_accessed=bytes_accessed),
    )(xt, *flat_params)

    # Back to [N, d_out], dropping the padded tail.
    return out_t[:, :n].T


def init_params(key, layers):
    """Deterministic synthetic init. Weights stored as [d_in, d_out]."""
    params = []
    for i in range(len(layers) - 1):
        key, kw, kb = jax.random.split(key, 3)
        fan_in = layers[i]
        w = jax.random.normal(kw, (layers[i], layers[i + 1]), jnp.float32)
        w = w / jnp.sqrt(jnp.float32(fan_in))
        b = 0.01 * jax.random.normal(kb, (1, layers[i + 1]), jnp.float32)
        params.append((w, b))
    return params


def reference_forward(x, lb, ub, params):
    """Plain-JAX reference matching the PyTorch module."""
    h = 2.0 * (x - lb) / (ub - lb) - 1.0
    for (w, b) in params[:-1]:
        h = jnp.tanh(h @ w + b)
    w, b = params[-1]
    z = h @ w + b
    return jnp.log(1.0 + jnp.exp(z))


if __name__ == "__main__":
    key = jax.random.PRNGKey(0)
    key, kx = jax.random.split(key)

    N = 300  # deliberately not a multiple of 128 to exercise the padded tail
    # Domain bounds (e.g. (x, t) in [-1, 1] x [0, 1]) broadcast over batch.
    lb = jnp.array([[-1.0, 0.0]], dtype=jnp.float32)   # [1, 2]
    ub = jnp.array([[1.0, 1.0]], dtype=jnp.float32)    # [1, 2]

    # Inputs inside the domain.
    u = jax.random.uniform(kx, (N, LAYERS[0]), jnp.float32)
    x = lb + (ub - lb) * u                             # [300, 2]

    params = init_params(jax.random.PRNGKey(42), LAYERS)

    out = jax.block_until_ready(net_dense_normalised(x, lb, ub, params))
    ref = reference_forward(x, lb, ub, params)

    assert out.shape == (N, LAYERS[-1])
    assert jnp.allclose(out, ref, atol=1e-5, rtol=1e-5), (
        f"max abs err {jnp.max(jnp.abs(out - ref))}")

    print("KERNEL_OK")
</pallas_src>

<mosaic_0001>
module attributes {stable_mosaic.version = 11 : i64} {
  func.func @_mlp_kernel(%arg0: i32, %arg1: memref<2x384xf32, #tpu.memory_space<vmem>>, %arg2: memref<32x2xf32, #tpu.memory_space<vmem>>, %arg3: memref<32x1xf32, #tpu.memory_space<vmem>>, %arg4: memref<32x32xf32, #tpu.memory_space<vmem>>, %arg5: memref<32x1xf32, #tpu.memory_space<vmem>>, %arg6: memref<32x32xf32, #tpu.memory_space<vmem>>, %arg7: memref<32x1xf32, #tpu.memory_space<vmem>>, %arg8: memref<1x32xf32, #tpu.memory_space<vmem>>, %arg9: memref<1x1xf32, #tpu.memory_space<vmem>>, %arg10: memref<1x384xf32, #tpu.memory_space<vmem>>) attributes {dimension_semantics = [#tpu.dimension_semantics<parallel>], iteration_bounds = array<i64: 1>, scalar_prefetch = 0 : i64, scratch_operands = 0 : i64, tpu.core_type = #tpu.core_type<tc>, window_params = [{transform_indices = @transform_0, window_bounds = array<i64: 2, 384>}, {pipeline_mode = #tpu.pipeline_mode<synchronous>, transform_indices = @transform_1, window_bounds = array<i64: 32, 2>}, {pipeline_mode = #tpu.pipeline_mode<synchronous>, transform_indices = @transform_2, window_bounds = array<i64: 32, 1>}, {pipeline_mode = #tpu.pipeline_mode<synchronous>, transform_indices = @transform_3, window_bounds = array<i64: 32, 32>}, {pipeline_mode = #tpu.pipeline_mode<synchronous>, transform_indices = @transform_4, window_bounds = array<i64: 32, 1>}, {pipeline_mode = #tpu.pipeline_mode<synchronous>, transform_indices = @transform_5, window_bounds = array<i64: 32, 32>}, {pipeline_mode = #tpu.pipeline_mode<synchronous>, transform_indices = @transform_6, window_bounds = array<i64: 32, 1>}, {pipeline_mode = #tpu.pipeline_mode<synchronous>, transform_indices = @transform_7, window_bounds = array<i64: 1, 32>}, {pipeline_mode = #tpu.pipeline_mode<synchronous>, transform_indices = @transform_8, window_bounds = array<i64: 1, 1>}, {transform_indices = @transform_9, window_bounds = array<i64: 1, 384>}]} {
    %c0 = arith.constant 0 : index
    %c0_0 = arith.constant 0 : index
    %0 = vector.load %arg2[%c0, %c0_0] : memref<32x2xf32, #tpu.memory_space<vmem>>, vector<32x2xf32>
    %c0_1 = arith.constant 0 : index
    %c0_2 = arith.constant 0 : index
    %1 = vector.load %arg1[%c0_1, %c0_2] : memref<2x384xf32, #tpu.memory_space<vmem>>, vector<2x384xf32>
    %cst = arith.constant dense<0.000000e+00> : vector<32x384xf32>
    %2 = tpu.matmul %0, %1, %cst {dimension_numbers = #tpu.dot_dimension_numbers<[1], [0], [0], [1], [0, 0, 1, 1], [], []>} : vector<32x2xf32>, vector<2x384xf32>, vector<32x384xf32> -> vector<32x384xf32>
    %c0_3 = arith.constant 0 : index
    %c0_4 = arith.constant 0 : index
    %3 = vector.load %arg3[%c0_3, %c0_4] : memref<32x1xf32, #tpu.memory_space<vmem>>, vector<32x1xf32>
    %4 = vector.broadcast %3 : vector<32x1xf32> to vector<32x384xf32>
    %5 = arith.addf %2, %4 : vector<32x384xf32>
    %6 = math.tanh %5 : vector<32x384xf32>
    %c0_5 = arith.constant 0 : index
    %c0_6 = arith.constant 0 : index
    %7 = vector.load %arg4[%c0_5, %c0_6] : memref<32x32xf32, #tpu.memory_space<vmem>>, vector<32x32xf32>
    %cst_7 = arith.constant dense<0.000000e+00> : vector<32x384xf32>
    %8 = tpu.matmul %7, %6, %cst_7 {dimension_numbers = #tpu.dot_dimension_numbers<[1], [0], [0], [1], [0, 0, 1, 1], [], []>} : vector<32x32xf32>, vector<32x384xf32>, vector<32x384xf32> -> vector<32x384xf32>
    %c0_8 = arith.constant 0 : index
    %c0_9 = arith.constant 0 : index
    %9 = vector.load %arg5[%c0_8, %c0_9] : memref<32x1xf32, #tpu.memory_space<vmem>>, vector<32x1xf32>
    %10 = vector.broadcast %9 : vector<32x1xf32> to vector<32x384xf32>
    %11 = arith.addf %8, %10 : vector<32x384xf32>
    %12 = math.tanh %11 : vector<32x384xf32>
    %c0_10 = arith.constant 0 : index
    %c0_11 = arith.constant 0 : index
    %13 = vector.load %arg6[%c0_10, %c0_11] : memref<32x32xf32, #tpu.memory_space<vmem>>, vector<32x32xf32>
    %cst_12 = arith.constant dense<0.000000e+00> : vector<32x384xf32>
    %14 = tpu.matmul %13, %12, %cst_12 {dimension_numbers = #tpu.dot_dimension_numbers<[1], [0], [0], [1], [0, 0, 1, 1], [], []>} : vector<32x32xf32>, vector<32x384xf32>, vector<32x384xf32> -> vector<32x384xf32>
    %c0_13 = arith.constant 0 : index
    %c0_14 = arith.constant 0 : index
    %15 = vector.load %arg7[%c0_13, %c0_14] : memref<32x1xf32, #tpu.memory_space<vmem>>, vector<32x1xf32>
    %16 = vector.broadcast %15 : vector<32x1xf32> to vector<32x384xf32>
    %17 = arith.addf %14, %16 : vector<32x384xf32>
    %18 = math.tanh %17 : vector<32x384xf32>
    %c0_15 = arith.constant 0 : index
    %c0_16 = arith.constant 0 : index
    %19 = vector.load %arg8[%c0_15, %c0_16] : memref<1x32xf32, #tpu.memory_space<vmem>>, vector<1x32xf32>
    %cst_17 = arith.constant dense<0.000000e+00> : vector<1x384xf32>
    %20 = tpu.matmul %19, %18, %cst_17 {dimension_numbers = #tpu.dot_dimension_numbers<[1], [0], [0], [1], [0, 0, 1, 1], [], []>} : vector<1x32xf32>, vector<32x384xf32>, vector<1x384xf32> -> vector<1x384xf32>
    %c0_18 = arith.constant 0 : index
    %c0_19 = arith.constant 0 : index
    %21 = vector.load %arg9[%c0_18, %c0_19] : memref<1x1xf32, #tpu.memory_space<vmem>>, vector<1x1xf32>
    %22 = vector.broadcast %21 : vector<1x1xf32> to vector<1x384xf32>
    %23 = arith.addf %20, %22 : vector<1x384xf32>
    %cst_20 = arith.constant 0.000000e+00 : f32
    %24 = vector.broadcast %cst_20 : f32 to vector<1x384xf32>
    %25 = arith.maximumf %23, %24 : vector<1x384xf32>
    %26 = math.absf %23 : vector<1x384xf32>
    %cst_21 = arith.constant 0.000000e+00 : f32
    %27 = vector.broadcast %cst_21 : f32 to vector<1x384xf32>
    %28 = arith.subf %27, %26 : vector<1x384xf32>
    %29 = math.exp %28 : vector<1x384xf32>
    %30 = math.log1p %29 : vector<1x384xf32>
    %31 = arith.addf %25, %30 : vector<1x384xf32>
    %c0_22 = arith.constant 0 : index
    %c0_23 = arith.constant 0 : index
    %32 = vector.load %arg10[%c0_22, %c0_23] : memref<1x384xf32, #tpu.memory_space<vmem>>, vector<1x384xf32>
    tpu.vector_store %arg10[%c0_22, %c0_23], %31 {strides = array<i32>} : memref<1x384xf32, #tpu.memory_space<vmem>>, vector<1x384xf32>,
    return
  }
  func.func @transform_0(%arg0: i32) -> (i32, i32) {
    %c0_i32 = arith.constant 0 : i32
    %c0_i32_0 = arith.constant 0 : i32
    return %c0_i32, %arg0 : i32, i32
  }
  func.func @transform_1(%arg0: i32) -> (i32, i32) {
    %c0_i32 = arith.constant 0 : i32
    %c0_i32_0 = arith.constant 0 : i32
    %c0_i32_1 = arith.constant 0 : i32
    return %c0_i32, %c0_i32_0 : i32, i32
  }
  func.func @transform_2(%arg0: i32) -> (i32, i32) {
    %c0_i32 = arith.constant 0 : i32
    %c0_i32_0 = arith.constant 0 : i32
    %c0_i32_1 = arith.constant 0 : i32
    return %c0_i32, %c0_i32_0 : i32, i32
  }
  func.func @transform_3(%arg0: i32) -> (i32, i32) {
    %c0_i32 = arith.constant 0 : i32
    %c0_i32_0 = arith.constant 0 : i32
    %c0_i32_1 = arith.constant 0 : i32
    return %c0_i32, %c0_i32_0 : i32, i32
  }
  func.func @transform_4(%arg0: i32) -> (i32, i32) {
    %c0_i32 = arith.constant 0 : i32
    %c0_i32_0 = arith.constant 0 : i32
    %c0_i32_1 = arith.constant 0 : i32
    return %c0_i32, %c0_i32_0 : i32, i32
  }
  func.func @transform_5(%arg0: i32) -> (i32, i32) {
    %c0_i32 = arith.constant 0 : i32
    %c0_i32_0 = arith.constant 0 : i32
    %c0_i32_1 = arith.constant 0 : i32
    return %c0_i32, %c0_i32_0 : i32, i32
  }
  func.func @transform_6(%arg0: i32) -> (i32, i32) {
    %c0_i32 = arith.constant 0 : i32
    %c0_i32_0 = arith.constant 0 : i32
    %c0_i32_1 = arith.constant 0 : i32
    return %c0_i32, %c0_i32_0 : i32, i32
  }
  func.func @transform_7(%arg0: i32) -> (i32, i32) {
    %c0_i32 = arith.constant 0 : i32
    %c0_i32_0 = arith.constant 0 : i32
    %c0_i32_1 = arith.constant 0 : i32
    return %c0_i32, %c0_i32_0 : i32, i32
  }
  func.func @transform_8(%arg0: i32) -> (i32, i32) {
    %c0_i32 = arith.constant 0 : i32
    %c0_i32_0 = arith.constant 0 : i32
    %c0_i32_1 = arith.constant 0 : i32
    return %c0_i32, %c0_i32_0 : i32, i32
  }
  func.func @transform_9(%arg0: i32) -> (i32, i32) {
    %c0_i32 = arith.constant 0 : i32
    %c0_i32_0 = arith.constant 0 : i32
    return %c0_i32, %arg0 : i32, i32
  }
}

</mosaic_0001>

<bundles_post_ra>
// kernel: net_dense_normalised.1
= control target key start
LH: loop header
LB: loop body
LE: loop exit
PB: predicated region body
PF: predicated region fallthrough
CT: control target
= control target key end

     0   :  { %v68_v0 = vlaneseq  ;;  %v1171_v1 = vmov 1983009808   ;;  %v1172_v3 = vmov 0.0   ;;  %v1173_v6 = vmov 0   ;;  %s1375_s2 = inlined_call_operand.vmem [shape: f32[32,1], index: 2, kind: input, shape index: {}]   ;;  %s1376_s8 = inlined_call_operand.<no memory space> [shape: f32[1,1], index: 8, kind: input, shape index: {}]   ;;  %s1377_s0 = inlined_call_operand.vmem [shape: f32[2,384], index: 0, kind: input, shape index: {}]   ;;  %s1378_s1 = inlined_call_operand.vmem [shape: f32[32,2], index: 1, kind: input, shape index: {}]   ;;  %s1379_s4 = inlined_call_operand.vmem [shape: f32[32,1], index: 4, kind: input, shape index: {}]   ;;  %s1380_s6 = inlined_call_operand.vmem [shape: f32[32,1], index: 6, kind: input, shape index: {}]   ;;  %s1381_s3 = inlined_call_operand.vmem [shape: f32[32,32], index: 3, kind: input, shape index: {}]   ;;  %s1382_s5 = inlined_call_operand.vmem [shape: f32[32,32], index: 5, kind: input, shape index: {}]   ;;  %s1383_s7 = inlined_call_operand.vmem [shape: f32[1,32], index: 7, kind: input, shape index: {}]   ;;  %s1384_s9 = inlined_call_operand.vmem [shape: f32[1,384], index: 9, kind: output, shape index: {}]  }
   0x1   :  { %v66_v2 = vunpack.c.l.s4 %v1171_v1  ;;  %164 = vmatprep.mubr.f32.mxu0 %v1172_v3  ;;  %182 = vmatprep.mubr.f32.mxu1 %v1172_v3  ;;  %v14_v4 = vstv %s1376_s8  ;;  %v42_v7 = vld [vmem:[%s1375_s2 + $0x18] sm:$0xff]  ;;  %v40_v9 = vld [vmem:[%s1375_s2 + $0x8] sm:$0xff]  ;;  %v38_v10 = vld [vmem:[%s1377_s0] sm:$0x3f]  ;;  %vm93_vm0 = vcmask 1041408   ;;  %vm80_vm1 = vcmask 15360  }
   0x2   :  { %v1232_v5 = vshrl.u32 %v68_v0, 7  ;;  %1084 = vset.pattern.permute.xlu0 %v1173_v6  ;;  %1085 = vset.pattern.permute.xlu1 %v1173_v6  ;;  %15 = vst [vmem:[#allocation2] sm:$0x1] %v14_v4  ;;  %v41_v11 = vld [vmem:[%s1375_s2 + $0x10] sm:$0xff]  ;;  %v39_v13 = vld [vmem:[%s1375_s2] sm:$0xff]  ;;  %v64_v14 = vcombine.high %v38_v10, %v38_v10  ;;  %v37_v18 = vld [vmem:[%s1378_s1 + $0x18] sm:$0xff] }
   0x3   :  { %v67_v8 = vunpack.c.0.s8 %v66_v2  ;;  %60 = vperm.xlu0 %1084, %v42_v7   ;;  %50 = vperm.xlu1 %1085, %v40_v9   ;;  %v34_v17 = vld [vmem:[%s1378_s1] sm:$0xff]  ;;  %v293_v20 = vld [vmem:[%s1379_s4 + $0x18] sm:$0xff]  ;;  %v292_v21 = vld [vmem:[%s1379_s4 + $0x10] sm:$0xff]  ;;  %vm314_vm2 = vcmask 261120   ;;  %vm1174_vm3 = vmmov 0   ;;  %vm968_vm7 = vcmp.lt.s32.totalorder %v68_v0, 384 }
   0x4   :  { %v35_v22 = vld [vmem:[%s1378_s1 + $0x8] sm:$0xff]  ;;  %v36_v23 = vld [vmem:[%s1378_s1 + $0x10] sm:$0xff]  ;;  %v290_v25 = vld [vmem:[%s1379_s4] sm:$0xff] }
   0x5   :  { %v70_v12 = vsub.s32 %v67_v8, %v1232_v5  ;;  %v291_v24 = vld [vmem:[%s1379_s4 + $0x8] sm:$0xff]  ;;  %v520_v26 = vld [vmem:[%s1380_s6 + $0x18] sm:$0xff]  ;;  %v519_v27 = vld [vmem:[%s1380_s6 + $0x10] sm:$0xff] }
   0x6   :  { %v518_v28 = vld [vmem:[%s1380_s6 + $0x8] sm:$0xff]  ;;  %v517_v29 = vld [vmem:[%s1380_s6] sm:$0xff] }
   0x7   :  { %v71_v15 = vrot.slane %v38_v10, %v70_v12  ;;  %55 = vperm.xlu0 %1084, %v41_v11   ;;  %45 = vperm.xlu1 %1085, %v39_v13   ;;  %v78_v19 = vrot.slane %v64_v14, %v70_v12  ;;  %v1306_v31 = vld [vmem:[%s1381_s3] sm:$0xff]  ;;  %v287_v11 = vld [vmem:[%s1381_s3 + $0x8] sm:$0xff]  ;;  %v288_v12 = vld [vmem:[%s1381_s3 + $0x10] sm:$0xff] }
   0x8   :  { %v289_v13 = vld [vmem:[%s1381_s3 + $0x18] sm:$0xff]  ;;  %v1334_v14 = vld [vmem:[%s1382_s5] sm:$0xff] }
   0x9   :  { %v79_v16 = vcombine.high %v71_v15, %v71_v15  ;;  %v740_v30 = vld [vmem:[#allocation2] sm:$0x1] }
   0xb   :  { %975 = vmatprep.subr.msk.mxu0 %vm93_vm0, %v79_v16  ;;  %1077 = vmatprep.subr.msk.mxu1 %vm93_vm0, %v79_v16 }
   0xc   :  { %976 = vmatpush1.msk.msra.mxu0 %vm93_vm0, %v71_v15  ;;  %1078 = vmatpush1.msk.msra.mxu1 %vm93_vm0, %v71_v15 }
   0xd   :  { %977 = vmatmul.mubr.msk.f32.vlgmr.msra.gmra.mxu0 %vm80_vm1, %v34_v17  ;;  %980 = vmatmul.mubr.msk.f32.vlgmr.msra.gmra.mxu1 %vm80_vm1, %v37_v18 }
   0xe   :  { %1030 = vmatprep.subr.msk.mxu1 %vm93_vm0, %v78_v19  ;;  %170 = vmatprep.mubr.f32.mxu0 %v1172_v3 }
   0xf   :  { %1031 = vmatpush3.msk.msra.mxu1 %vm93_vm0, %v78_v19  ;;  %1032 = vmatprep.mubr.msk.f32.mxu1 %vm80_vm1, %v34_v17 }
  0x10   :  { %311 = vperm.xlu0 %1084, %v293_v20   ;;  %306 = vperm.xlu1 %1085, %v292_v21  }
  0x11   :  { %978 = vmatmul.mubr.msk.f32.gmra.mxu0 %vm80_vm1, %v35_v22  ;;  %1033 = vmatmul.mubr.msk.f32.vlgmr.msra.gmra.mxu1 %vm80_vm1, %v35_v22 }
  0x12   :  { %176 = vmatprep.mubr.f32.mxu0 %v1172_v3  ;;  %1035 = vmatprep.mubr.msk.f32.mxu1 %vm80_vm1, %v36_v23 }
  0x14   :  { %301 = vperm.xlu0 %1084, %v291_v24   ;;  %296 = vperm.xlu1 %1085, %v290_v25  }
  0x15   :  { %979 = vmatmul.mubr.msk.f32.gmra.mxu0 %vm80_vm1, %v36_v23  ;;  %1036 = vmatmul.mubr.msk.f32.gmra.mxu1 %vm80_vm1, %v37_v18 }
  0x16   :  { %391 = vmatprep.mubr.f32.mxu1 %v1172_v3  ;;  %1046 = vmatprep.mubr.msk.f32.mxu0 %vm314_vm2, %v1306_v31 }
  0x18   :  { %538 = vperm.xlu0 %1084, %v520_v26   ;;  %533 = vperm.xlu1 %1085, %v519_v27  }
  0x1c   :  { %528 = vperm.xlu0 %1084, %v518_v28   ;;  %523 = vperm.xlu1 %1085, %v517_v29  }
  0x20   :  { %743 = vperm.xlu0 %1084, %v740_v30  }
  0x7e   :  { %v51_v32 = vpop.permute.xlu1 %50  ;;  %v61_v33 = vpop.permute.xlu0 %60 }
  0x82   :  { %v46_v39 = vpop.permute.xlu1 %45  ;;  %v56_v47 = vpop.permute.xlu0 %55 }
  0x8b   :  { %v312_v16 = vpop.permute.xlu0 %311  ;;  %v307_v19 = vpop.permute.xlu1 %306 }
  0x8f   :  { %v302_v25 = vpop.permute.xlu0 %301  ;;  %v297_v30 = vpop.permute.xlu1 %296 }
  0xcd   :  { %v166_v34 = vpop.f32.mrf.mxu0  ;;  %v184_v35 = vpop.f32.mrf.mxu1 }
  0xce   :  { %v185_v36 = vadd.f32 %v184_v35, %v61_v33  ;;  %v167_v43 = vadd.f32 %v166_v34, %v46_v39 }
  0xcf   :  { %v168_v37 = vpop.f32.mrf.mxu0  ;;  %v186_v38 = vpop.f32.mrf.mxu1 }
  0xd0   :  { %v187_v40 = vadd.f32 %v186_v38, %v61_v33  ;;  %1087 = vtanh.f32 %v185_v36  ;;  %v169_v58 = vadd.f32 %v168_v37, %v46_v39 }
  0xd1   :  { %v172_v41 = vpop.f32.mrf.mxu0  ;;  %v1034_v42 = vpop.f32.mrf.mxu1 }
  0xd2   :  { %1089 = vtanh.f32 %v187_v40  ;;  %v173_v44 = vadd.f32 %v172_v41, %v51_v32  ;;  %v261_v57 = vadd.f32 %v1034_v42, %v51_v32 }
  0xd3   :  { %v174_v45 = vpop.f32.mrf.mxu0  ;;  %v255_v46 = vpop.f32.mrf.mxu1  ;;  %1091 = vtanh.f32 %v167_v43 }
  0xd4   :  { %1093 = vtanh.f32 %v173_v44  ;;  %v175_v54 = vadd.f32 %v174_v45, %v51_v32  ;;  %v256_v59 = vadd.f32 %v255_v46, %v46_v39 }
  0xd5   :  { %v178_v48 = vpop.f32.mrf.mxu0  ;;  %v1037_v49 = vpop.f32.mrf.mxu1 }
  0xd6   :  { %v179_v50 = vadd.f32 %v178_v48, %v56_v47  ;;  %v271_v51 = vadd.f32 %v1037_v49, %v61_v33  ;;  %v515_v48 = vld [vmem:[%s1382_s5 + $0x10] sm:$0xff] }
  0xd7   :  { %v180_v52 = vpop.f32.mrf.mxu0  ;;  %v265_v53 = vpop.f32.mrf.mxu1 }
  0xd8   :  { %1095 = vtanh.f32 %v179_v50  ;;  %v181_v55 = vadd.f32 %v180_v52, %v56_v47  ;;  %v266_v56 = vadd.f32 %v265_v53, %v56_v47  ;;  %v514_v47 = vld [vmem:[%s1382_s5 + $0x8] sm:$0xff] }
  0xd9   :  { %1097 = vtanh.f32 %v271_v51  ;;  %v516_v51 = vld [vmem:[%s1382_s5 + $0x18] sm:$0xff] }
  0xda   :  { %1099 = vtanh.f32 %v181_v55 }
  0xdb   :  { %1101 = vtanh.f32 %v266_v56 }
  0xdc   :  { %1103 = vtanh.f32 %v175_v54 }
  0xdd   :  { %1105 = vtanh.f32 %v261_v57  ;;  %v1088_v60 = vpop.eup %1087 }
  0xde   :  { %1107 = vtanh.f32 %v169_v58  ;;  %v539_v58 = vpop.permute.xlu0 %538 }
  0xdf   :  { %1109 = vtanh.f32 %v256_v59  ;;  %v1090_v61 = vpop.eup %1089 }
  0xe0   :  { %351 = vmatprep.subr.mxu1 %v1090_v61  ;;  %v1092_v62 = vpop.eup %1091 }
  0xe1   :  { %352 = vmatpush1.msra.mxu1 %v1088_v60  ;;  %v1094_v63 = vpop.eup %1093  ;;  %v534_v60 = vpop.permute.xlu1 %533 }
  0xe5   :  { %v1096_v1 = vpop.eup %1095 }
  0xe6   :  { %v1098_v2 = vpop.eup %1097 }
  0xe7   :  { %v1100_v4 = vpop.eup %1099  ;;  %1038 = vmatprep.subr.mxu0 %v1098_v2 }
  0xe8   :  { %v1102_v6 = vpop.eup %1101  ;;  %1039 = vmatpush3.msra.mxu0 %v1098_v2  ;;  %353 = vmatprep.subr.mxu1 %v1100_v4 }
  0xe9   :  { %v1104_v7 = vpop.eup %1103  ;;  %1040 = vmatprep.subr.mxu0 %v1102_v6  ;;  %354 = vmatpush1.msra.mxu1 %v1096_v1  ;;  %v529_v1 = vpop.permute.xlu0 %528 }
  0xea   :  { %v1106_v8 = vpop.eup %1105  ;;  %1041 = vmatpush3.msra.mxu0 %v1102_v6  ;;  %355 = vmatprep.subr.mxu1 %v1104_v7  ;;  %v524_v7 = vpop.permute.xlu1 %523 }
  0xeb   :  { %v1108_v9 = vpop.eup %1107  ;;  %1042 = vmatprep.subr.mxu0 %v1106_v8  ;;  %356 = vmatpush1.msra.mxu1 %v1094_v63 }
  0xec   :  { %v1110_v10 = vpop.eup %1109  ;;  %1043 = vmatpush3.msra.mxu0 %v1106_v8  ;;  %357 = vmatprep.subr.mxu1 %v1108_v9 }
  0xed   :  { %1044 = vmatprep.subr.mxu0 %v1110_v10  ;;  %358 = vmatpush1.msra.mxu1 %v1092_v62 }
  0xee   :  { %1045 = vmatpush3.msra.mxu0 %v1110_v10  ;;  %986 = vmatmul.mubr.msk.f32.vlgmr.msra.gmra.mxu1 %vm314_vm2, %v1306_v31 }
  0xef   :  { %1047 = vmatmul.mubr.msk.f32.vlgmr.msra.gmra.mxu0 %vm314_vm2, %v287_v11  ;;  %397 = vmatprep.mubr.f32.mxu1 %v1172_v3 }
  0xf0   :  { %1049 = vmatprep.mubr.msk.f32.mxu0 %vm314_vm2, %v288_v12 }
  0xf2   :  { %987 = vmatmul.mubr.msk.f32.gmra.mxu1 %vm314_vm2, %v287_v11 }
  0xf3   :  { %1050 = vmatmul.mubr.msk.f32.gmra.mxu0 %vm314_vm2, %v289_v13  ;;  %403 = vmatprep.mubr.f32.mxu1 %v1172_v3 }
  0xf4   :  { %617 = vmatprep.mubr.f32.mxu0 %v1172_v3 }
  0xf6   :  { %988 = vmatmul.mubr.msk.f32.gmra.mxu1 %vm314_vm2, %v288_v12 }
  0xf7   :  { %409 = vmatprep.mubr.f32.mxu1 %v1172_v3 }
  0xfa   :  { %989 = vmatmul.mubr.msk.f32.gmra.mxu1 %vm314_vm2, %v289_v13 }
  0xfb   :  { %1060 = vmatprep.mubr.msk.f32.mxu1 %vm314_vm2, %v1334_v14 }
 0x1ae   :  { %v393_v15 = vpop.f32.mrf.mxu1 }
 0x1af   :  { %v1048_v17 = vpop.f32.mrf.mxu0  ;;  %v394_v42 = vadd.f32 %v393_v15, %v297_v30 }
 0x1b0   :  { %v395_v18 = vpop.f32.mrf.mxu1  ;;  %v488_v27 = vadd.f32 %v1048_v17, %v302_v25 }
 0x1b1   :  { %v482_v20 = vpop.f32.mrf.mxu0  ;;  %v396_v41 = vadd.f32 %v395_v18, %v297_v30 }
 0x1b2   :  { %v399_v21 = vpop.f32.mrf.mxu1  ;;  %v483_v31 = vadd.f32 %v482_v20, %v297_v30 }
 0x1b3   :  { %v1051_v22 = vpop.f32.mrf.mxu0  ;;  %v400_v40 = vadd.f32 %v399_v21, %v302_v25 }
 0x1b4   :  { %v498_v23 = vadd.f32 %v1051_v22, %v312_v16  ;;  %v401_v24 = vpop.f32.mrf.mxu1 }
 0x1b5   :  { %v492_v26 = vpop.f32.mrf.mxu0  ;;  %v402_v39 = vadd.f32 %v401_v24, %v302_v25  ;;  %v739_v24 = vld [vmem:[%s1383_s7] sm:$0x1] }
 0x1b6   :  { %1111 = vtanh.f32 %v498_v23  ;;  %v493_v28 = vadd.f32 %v492_v26, %v307_v19  ;;  %v405_v29 = vpop.f32.mrf.mxu1 }
 0x1b7   :  { %v406_v38 = vadd.f32 %v405_v29, %v307_v19 }
 0x1b8   :  { %1113 = vtanh.f32 %v493_v28  ;;  %v407_v32 = vpop.f32.mrf.mxu1 }
 0x1b9   :  { %1115 = vtanh.f32 %v488_v27  ;;  %v408_v36 = vadd.f32 %v407_v32, %v307_v19 }
 0x1ba   :  { %v411_v33 = vpop.f32.mrf.mxu1  ;;  %1117 = vtanh.f32 %v483_v31 }
 0x1bb   :  { %v412_v34 = vadd.f32 %v411_v33, %v312_v16 }
 0x1bc   :  { %v413_v35 = vpop.f32.mrf.mxu1 }
 0x1bd   :  { %v414_v37 = vadd.f32 %v413_v35, %v312_v16 }
 0x1bf   :  { %1119 = vtanh.f32 %v414_v37  ;;  %v748_v37 = vsub.s32 0, %v1232_v5 }
 0x1c0   :  { %1121 = vtanh.f32 %v412_v34 }
 0x1c1   :  { %1123 = vtanh.f32 %v408_v36 }
 0x1c2   :  { %1125 = vtanh.f32 %v406_v38 }
 0x1c3   :  { %v1112_v43 = vpop.eup %1111  ;;  %1127 = vtanh.f32 %v402_v39  ;;  %v744_v39 = vpop.permute.xlu0 %743 }
 0x1c4   :  { %1129 = vtanh.f32 %v400_v40  ;;  %1052 = vmatprep.subr.mxu1 %v1112_v43 }
 0x1c5   :  { %v1114_v44 = vpop.eup %1113  ;;  %1131 = vtanh.f32 %v396_v41  ;;  %1053 = vmatpush3.msra.mxu1 %v1112_v43  ;;  %v749_v41 = vrot.slane %v744_v39, %v748_v37 }
 0x1c6   :  { %1133 = vtanh.f32 %v394_v42  ;;  %1054 = vmatprep.subr.mxu1 %v1114_v44  ;;  %v1116_v45 = vpop.eup %1115 }
 0x1c7   :  { %1055 = vmatpush3.msra.mxu1 %v1114_v44  ;;  %v1118_v46 = vpop.eup %1117 }
 0x1c8   :  { %1056 = vmatprep.subr.mxu1 %v1116_v45 }
 0x1c9   :  { %1057 = vmatpush3.msra.mxu1 %v1116_v45 }
 0x1ca   :  { %1058 = vmatprep.subr.mxu1 %v1118_v46 }
 0x1cb   :  { %1059 = vmatpush3.msra.mxu1 %v1118_v46 }
 0x1cc   :  { %v1120_v49 = vpop.eup %1119  ;;  %1061 = vmatmul.mubr.msk.f32.vlgmr.msra.gmra.mxu1 %vm314_vm2, %v514_v47 }
 0x1cd   :  { %v1122_v50 = vpop.eup %1121  ;;  %577 = vmatprep.subr.mxu0 %v1120_v49  ;;  %1063 = vmatprep.mubr.msk.f32.mxu1 %vm314_vm2, %v515_v48 }
 0x1ce   :  { %v1124_v52 = vpop.eup %1123  ;;  %578 = vmatpush1.msra.mxu0 %v1122_v50 }
 0x1cf   :  { %v1126_v53 = vpop.eup %1125  ;;  %579 = vmatprep.subr.mxu0 %v1124_v52 }
 0x1d0   :  { %v1128_v54 = vpop.eup %1127  ;;  %1064 = vmatmul.mubr.msk.f32.gmra.mxu1 %vm314_vm2, %v516_v51  ;;  %580 = vmatpush1.msra.mxu0 %v1126_v53 }
 0x1d1   :  { %v1130_v55 = vpop.eup %1129  ;;  %581 = vmatprep.subr.mxu0 %v1128_v54  ;;  %817 = vmatprep.mubr.f32.mxu1 %v1172_v3 }
 0x1d2   :  { %v1132_v56 = vpop.eup %1131  ;;  %582 = vmatpush1.msra.mxu0 %v1130_v55 }
 0x1d3   :  { %v1134_v57 = vpop.eup %1133  ;;  %583 = vmatprep.subr.mxu0 %v1132_v56 }
 0x1d4   :  { %584 = vmatpush1.msra.mxu0 %v1134_v57 }
 0x1d5   :  { %994 = vmatmul.mubr.msk.f32.vlgmr.msra.gmra.mxu0 %vm314_vm2, %v1334_v14  ;;  %1066 = vmatprep.subr.mxu0 %v1172_v3 }
 0x1d6   :  { %623 = vmatprep.mubr.f32.mxu0 %v1172_v3 }
 0x1d9   :  { %995 = vmatmul.mubr.msk.f32.gmra.mxu0 %vm314_vm2, %v514_v47 }
 0x1da   :  { %629 = vmatprep.mubr.f32.mxu0 %v1172_v3 }
 0x1dd   :  { %996 = vmatmul.mubr.msk.f32.gmra.mxu0 %vm314_vm2, %v515_v48 }
 0x1de   :  { %635 = vmatprep.mubr.f32.mxu0 %v1172_v3 }
 0x1e1   :  { %997 = vmatmul.mubr.msk.f32.gmra.mxu0 %vm314_vm2, %v516_v51 }
 0x1e2   :  { %1074 = vmatprep.mubr.msk.f32.mxu0 %vm1174_vm3, %v1172_v3 }
 0x28c   :  { %v1062_v59 = vpop.f32.mrf.mxu1 }
 0x28d   :  { %v714_v4 = vadd.f32 %v1062_v59, %v529_v1 }
 0x28e   :  { %v708_v61 = vpop.f32.mrf.mxu1 }
 0x28f   :  { %v709_v8 = vadd.f32 %v708_v61, %v524_v7 }
 0x290   :  { %v1065_v62 = vpop.f32.mrf.mxu1 }
 0x291   :  { %v724_v63 = vadd.f32 %v1065_v62, %v539_v58 }
 0x292   :  { %v718_v2 = vpop.f32.mrf.mxu1 }
 0x293   :  { %1135 = vtanh.f32 %v724_v63  ;;  %v719_v6 = vadd.f32 %v718_v2, %v534_v60 }
 0x295   :  { %1137 = vtanh.f32 %v719_v6  ;;  %v619_v9 = vpop.f32.mrf.mxu0 }
 0x296   :  { %1139 = vtanh.f32 %v714_v4  ;;  %v620_v29 = vadd.f32 %v619_v9, %v524_v7 }
 0x297   :  { %v621_v10 = vpop.f32.mrf.mxu0  ;;  %1141 = vtanh.f32 %v709_v8  ;;  %v1175_v8 = vmov 1966171168  }
 0x298   :  { %v622_v28 = vadd.f32 %v621_v10, %v524_v7  ;;  %v944_v9 = vunpack.c.l.s4 %v1175_v8 }
 0x299   :  { %v625_v11 = vpop.f32.mrf.mxu0 }
 0x29a   :  { %v626_v27 = vadd.f32 %v625_v11, %v529_v1 }
 0x29b   :  { %v627_v12 = vpop.f32.mrf.mxu0 }
 0x29c   :  { %v628_v26 = vadd.f32 %v627_v12, %v529_v1 }
 0x29d   :  { %v631_v13 = vpop.f32.mrf.mxu0 }
 0x29e   :  { %v632_v23 = vadd.f32 %v631_v13, %v534_v60 }
 0x29f   :  { %v633_v14 = vpop.f32.mrf.mxu0 }
 0x2a0   :  { %v1136_v15 = vpop.eup %1135  ;;  %v634_v21 = vadd.f32 %v633_v14, %v534_v60 }
 0x2a1   :  { %1067 = vmatpush3.msra.mxu0 %v1136_v15  ;;  %v637_v16 = vpop.f32.mrf.mxu0 }
 0x2a2   :  { %v1138_v17 = vpop.eup %1137  ;;  %1068 = vmatprep.subr.mxu0 %v1172_v3  ;;  %v638_v18 = vadd.f32 %v637_v16, %v539_v58 }
 0x2a3   :  { %1069 = vmatpush3.msra.mxu0 %v1138_v17  ;;  %v639_v19 = vpop.f32.mrf.mxu0  ;;  %v1140_v20 = vpop.eup %1139 }
 0x2a4   :  { %v640_v22 = vadd.f32 %v639_v19, %v539_v58  ;;  %1070 = vmatprep.subr.mxu0 %v1172_v3  ;;  %v1142_v25 = vpop.eup %1141  ;;  %v945_v19 = vunpack.c.0.s8 %v944_v9 }
 0x2a5   :  { %1071 = vmatpush3.msra.mxu0 %v1140_v20 }
 0x2a6   :  { %1143 = vtanh.f32 %v640_v22  ;;  %1072 = vmatprep.subr.mxu0 %v1172_v3 }
 0x2a7   :  { %1145 = vtanh.f32 %v638_v18  ;;  %1073 = vmatpush3.msra.mxu0 %v1142_v25 }
 0x2a8   :  { %1147 = vtanh.f32 %v634_v21  ;;  %1075 = vmatmul.mubr.msk.f32.vlgmr.msra.gmra.mxu0 %vm314_vm2, %v739_v24 }
 0x2a9   :  { %1149 = vtanh.f32 %v632_v23 }
 0x2aa   :  { %1151 = vtanh.f32 %v628_v26 }
 0x2ab   :  { %1153 = vtanh.f32 %v626_v27 }
 0x2ac   :  { %1155 = vtanh.f32 %v622_v28 }
 0x2ad   :  { %1157 = vtanh.f32 %v620_v29  ;;  %v948_v29 = vsub.s32 %v945_v19, %v1232_v5 }
 0x2b3   :  { %v1144_v30 = vpop.eup %1143 }
 0x2b4   :  { %v1146_v31 = vpop.eup %1145  ;;  %777 = vmatprep.subr.mxu1 %v1144_v30 }
 0x2b5   :  { %v1148_v32 = vpop.eup %1147  ;;  %778 = vmatpush1.msra.mxu1 %v1146_v31 }
 0x2b6   :  { %v1150_v33 = vpop.eup %1149  ;;  %779 = vmatprep.subr.mxu1 %v1148_v32 }
 0x2b7   :  { %v1152_v3 = vpop.eup %1151  ;;  %780 = vmatpush1.msra.mxu1 %v1150_v33 }
 0x2b8   :  { %v1154_v34 = vpop.eup %1153  ;;  %781 = vmatprep.subr.mxu1 %v1152_v3 }
 0x2b9   :  { %v1156_v35 = vpop.eup %1155  ;;  %782 = vmatpush1.msra.mxu1 %v1154_v34 }
 0x2ba   :  { %v1158_v36 = vpop.eup %1157  ;;  %783 = vmatprep.subr.mxu1 %v1156_v35 }
 0x2bb   :  { %784 = vmatpush1.msra.mxu1 %v1158_v36 }
 0x2bc   :  { %1002 = vmatmul.mubr.msk.f32.vlgmr.msra.gmra.mxu1 %vm314_vm2, %v739_v24 }
 0x368   :  { %v890_v38 = vpop.f32.mrf.mxu0 }
 0x369   :  { %v891_v42 = vadd.f32 %v890_v38, %v749_v41 }
 0x36a   :  { %v1076_v40 = vpop.f32.mrf.mxu0 }
 0x36b   :  { %v899_v43 = vand.u32 2147483647, %v891_v42  ;;  %v896_v24 = vmax.f32 %v891_v42, 0.0 }
 0x36d   :  { %v902_v44 = vsub.f32 0.0, %v899_v43 }
 0x36f   :  { %v907_v45 = vmul.f32 1.442695, %v902_v44 }
 0x371   :  { %1159 = vpow2.f32 %v907_v45 }
 0x37c   :  { %v819_v46 = vpop.f32.mrf.mxu1 }
 0x37d   :  { %v820_v47 = vadd.f32 %v819_v46, %v749_v41 }
 0x37e   :  { %v821_v48 = vpop.f32.mrf.mxu1  ;;  %v1160_v56 = vpop.eup %1159 }
 0x37f   :  { %v897_v49 = vand.u32 2147483647, %v820_v47  ;;  %v822_v50 = vadd.f32 %v821_v48, %v749_v41  ;;  %v927_v57 = vadd.f32 1.0, %v1160_v56  ;;  %v930_v62 = vmul.f32 -0.5, %v1160_v56 }
 0x380   :  { %v933_v7 = vand.u32 2147483647, %v1160_v56  ;;  %v894_v25 = vmax.f32 %v820_v47, 0.0 }
 0x381   :  { %v900_v51 = vsub.f32 0.0, %v897_v49  ;;  %v898_v52 = vand.u32 2147483647, %v822_v50  ;;  %v931_v4 = vadd.f32 1.0, %v930_v62  ;;  %v895_v26 = vmax.f32 %v822_v50, 0.0 }
 0x382   :  { %vm934_vm4 = vcmp.lt.f32.partialorder %v933_v7, 0.0004427343 }
 0x383   :  { %v903_v53 = vmul.f32 1.442695, %v900_v51  ;;  %v901_v54 = vsub.f32 0.0, %v898_v52  ;;  %v932_v15 = vmul.f32 %v1160_v56, %v931_v4 }
 0x385   :  { %1161 = vpow2.f32 %v903_v53  ;;  %v905_v55 = vmul.f32 1.442695, %v901_v54 }
 0x387   :  { %1163 = vpow2.f32 %v905_v55 }
 0x388   :  { %1165 = vlog2.f32 %v927_v57 }
 0x392   :  { %v1162_v58 = vpop.eup %1161 }
 0x393   :  { %v909_v59 = vadd.f32 1.0, %v1162_v58  ;;  %v912_v63 = vmul.f32 -0.5, %v1162_v58  ;;  %v915_v10 = vand.u32 2147483647, %v1162_v58 }
 0x394   :  { %v1164_v60 = vpop.eup %1163 }
 0x395   :  { %1167 = vlog2.f32 %v909_v59  ;;  %v918_v61 = vadd.f32 1.0, %v1164_v60  ;;  %v921_v1 = vmul.f32 -0.5, %v1164_v60  ;;  %v1166_v2 = vpop.eup %1165  ;;  %v913_v6 = vadd.f32 1.0, %v912_v63 }
 0x396   :  { %v929_v11 = vmul.f32 0.6931472, %v1166_v2  ;;  %v924_v14 = vand.u32 2147483647, %v1164_v60  ;;  %vm916_vm5 = vcmp.lt.f32.partialorder %v915_v10, 0.0004427343 }
 0x397   :  { %1169 = vlog2.f32 %v918_v61  ;;  %v922_v12 = vadd.f32 1.0, %v921_v1  ;;  %v914_v17 = vmul.f32 %v1162_v58, %v913_v6 }
 0x398   :  { %v935_v20 = vsel %vm934_vm4, %v932_v15, %v929_v11  ;;  %vm925_vm6 = vcmp.lt.f32.partialorder %v924_v14, 0.0004427343 }
 0x399   :  { %v923_v23 = vmul.f32 %v1164_v60, %v922_v12  ;;  %v938_v28 = vadd.f32 %v935_v20, %v896_v24 }
 0x39b   :  { %v956_v33 = vrot.slane %v938_v28, %v948_v29 }
 0x3a2   :  { %v1168_v13 = vpop.eup %1167 }
 0x3a3   :  { %v911_v16 = vmul.f32 0.6931472, %v1168_v13 }
 0x3a4   :  { %v1170_v18 = vpop.eup %1169 }
 0x3a5   :  { %v917_v21 = vsel %vm916_vm5, %v914_v17, %v911_v16  ;;  %v920_v22 = vmul.f32 0.6931472, %v1170_v18 }
 0x3a6   :  { %v936_v30 = vadd.f32 %v917_v21, %v894_v25 }
 0x3a7   :  { %v926_v27 = vsel %vm925_vm6, %v923_v23, %v920_v22 }
 0x3a8   :  { %v937_v31 = vadd.f32 %v926_v27, %v895_v26 }
 0x3aa   :  { %v942_v32 = vcombine.low %v936_v30, %v937_v31 }
 0x3ac   :  { %v949_v3 = vrot.slane %v942_v32, %v948_v29 }
 0x3ae   :  { %v957_v34 = vcombine.low %v949_v3, %v956_v33 }
 0x3b0   :  { %v964_v35 = vrot.slane %v957_v34, %v948_v29 }
 0x3b2   :  { %970 = vst.msk [vmem:[%s1384_s9] sm:$0x7] %vm968_vm7, %v964_v35 }

</bundles_post_ra>
